<compile_context>
chip_gen: v5e
topology: v5e:2x2
jax: 0.10.0
libtpu: 0.0.40
codegen_flags: <defaults>
</compile_context>

<pallas_src>
import jax
import jax.numpy as jnp
from jax.experimental import pallas as pl
from jax.experimental.pallas import tpu as pltpu

FEATURE_DIM = 2048      # EfficientNet-B5 feature channels feeding the head
NUM_CLASSES = 8         # cfg.MODEL.num_class (synthetic choice)


def net_kernel(x_ref, w_stem_ref, w_fc_ref, b_fc_ref, out_ref, acc_ref):
    # x_ref:      (B, C_in, TILE_P)   raw pixels (0..255), spatial on lanes
    # w_stem_ref: (C_in, 2048)        backbone stand-in, pre-scaled by 1/(255*H*W)
    # w_fc_ref:   (2048, num_classes)
    # b_fc_ref:   (1, num_classes)
    # out_ref:    (B, num_classes)
    # acc_ref:    (B, C_in) f32 scratch accumulator for the spatial sum
    p = pl.program_id(0)

    @pl.when(p == 0)
    def _():
        acc_ref[...] = jnp.zeros_like(acc_ref)

    # Partial global-average-pool: sum over the lane (spatial) axis.
    # (1/255 and 1/(H*W) are folded into w_stem, so a plain sum suffices.)
    acc_ref[...] += jnp.sum(x_ref[...], axis=-1)  # (B, C_in)

    @pl.when(p == pl.num_programs(0) - 1)
    def _():
        pooled = acc_ref[...]                                  # (B, C_in)
        # Backbone stand-in (pool commuted before the linear 1x1 conv).
        feat = jnp.dot(pooled, w_stem_ref[...],
                       preferred_element_type=jnp.float32)     # (B, 2048)
        # Dropout(0.5): eval/inference semantics -> identity.
        # self._fc: Linear(2048, num_classes, bias=True)
        logits = jnp.dot(feat, w_fc_ref[...],
                         preferred_element_type=jnp.float32) + b_fc_ref[...]
        out_ref[...] = logits.astype(out_ref.dtype)


def net_forward(x_nchw, w_stem, w_fc, b_fc):
    """x_nchw: (B, C_in, H, W) float32 in [0, 255]."""
    B, C, H, W = x_nchw.shape
    P = H * W
    # Keep NCHW; just flatten spatial -> (B, C, H*W). Spatial axis is lane-dense.
    x_flat = x_nchw.reshape(B, C, P)

    # Fold the 1/255 input scaling and the 1/(H*W) average-pool factor into the
    # (tiny) stem weights: bit-for-bit equivalent by linearity.
    w_stem_scaled = (w_stem * (1.0 / (255.0 * P))).astype(jnp.float32)

    # Tile the spatial (reduction) axis; 128-multiple tiles keep lanes dense.
    TILE_P = 128 if P % 128 == 0 else P
    grid = (P // TILE_P,)

    return pl.pallas_call(
        net_kernel,
        out_shape=jax.ShapeDtypeStruct((B, NUM_CLASSES), jnp.float32),
        grid_spec=pltpu.PrefetchScalarGridSpec(
            num_scalar_prefetch=0,
            grid=grid,
            in_specs=[
                # streamed input tile: spatial axis advances with the grid
                pl.BlockSpec((B, C, TILE_P), lambda p: (0, 0, p)),
                # weights / bias: resident across all grid steps
                pl.BlockSpec((C, FEATURE_DIM), lambda p: (0, 0)),
                pl.BlockSpec((FEATURE_DIM, NUM_CLASSES), lambda p: (0, 0)),
                pl.BlockSpec((1, NUM_CLASSES), lambda p: (0, 0)),
            ],
            out_specs=pl.BlockSpec((B, NUM_CLASSES), lambda p: (0, 0)),
            scratch_shapes=[pltpu.VMEM((B, C), jnp.float32)],
        ),
        compiler_params=pltpu.CompilerParams(
            # single grid axis is a reduction (accumulator carried in scratch)
            dimension_semantics=("arbitrary",),
        ),
    )(x_flat, w_stem_scaled, w_fc, b_fc.reshape(1, NUM_CLASSES))


if __name__ == "__main__":
    key = jax.random.PRNGKey(0)
    k_x, k_stem, k_fc, k_b = jax.random.split(key, 4)

    B, C, H, W = 2, 3, 16, 16   # P = 256 -> 2 grid steps (exercises accumulator)
    # synthetic image-like input in [0, 255]
    x = jax.random.uniform(k_x, (B, C, H, W), jnp.float32, 0.0, 255.0)

    # deterministic parameter init (shapes implied by the module's __init__)
    w_stem = jax.random.normal(k_stem, (C, FEATURE_DIM), jnp.float32) * 0.05
    w_fc = jax.random.normal(k_fc, (FEATURE_DIM, NUM_CLASSES), jnp.float32) * 0.02
    b_fc = jax.random.normal(k_b, (NUM_CLASSES,), jnp.float32) * 0.01

    out = net_forward(x, w_stem, w_fc, b_fc)
    jax.block_until_ready(out)

    # reference check (pure JAX, original op order: scale -> 1x1 conv -> pool -> fc)
    x_ref = jnp.transpose(x, (0, 2, 3, 1)).reshape(B, H * W, C) / 255.0
    feat_ref = jnp.einsum("bpc,cf->bpf", x_ref, w_stem)
    ref = jnp.mean(feat_ref, axis=1) @ w_fc + b_fc
    assert out.shape == (B, NUM_CLASSES)
    assert jnp.allclose(out, ref, atol=1e-3, rtol=1e-3)

    print("KERNEL_OK")
</pallas_src>

<mosaic_0001>
module attributes {stable_mosaic.version = 11 : i64} {
  func.func @net_kernel(%arg0: i32, %arg1: memref<2x3x128xf32, #tpu.memory_space<vmem>>, %arg2: memref<3x2048xf32, #tpu.memory_space<vmem>>, %arg3: memref<2048x8xf32, #tpu.memory_space<vmem>>, %arg4: memref<1x8xf32, #tpu.memory_space<vmem>>, %arg5: memref<2x8xf32, #tpu.memory_space<vmem>>, %arg6: memref<2x3xf32, #tpu.memory_space<vmem>>) attributes {dimension_semantics = [#tpu.dimension_semantics<arbitrary>], iteration_bounds = array<i64: 2>, scalar_prefetch = 0 : i64, scratch_operands = 1 : i64, tpu.core_type = #tpu.core_type<tc>, window_params = [{transform_indices = @transform_0, window_bounds = array<i64: 2, 3, 128>}, {pipeline_mode = #tpu.pipeline_mode<synchronous>, transform_indices = @transform_1, window_bounds = array<i64: 3, 2048>}, {pipeline_mode = #tpu.pipeline_mode<synchronous>, transform_indices = @transform_2, window_bounds = array<i64: 2048, 8>}, {pipeline_mode = #tpu.pipeline_mode<synchronous>, transform_indices = @transform_3, window_bounds = array<i64: 1, 8>}, {pipeline_mode = #tpu.pipeline_mode<synchronous>, transform_indices = @transform_4, window_bounds = array<i64: 2, 8>}]} {
    %c0_i32 = arith.constant 0 : i32
    %0 = arith.cmpi eq, %arg0, %c0_i32 : i32
    %1 = arith.extui %0 : i1 to i32
    %c0_i32_0 = arith.constant 0 : i32
    %2 = arith.cmpi ne, %1, %c0_i32_0 : i32
    scf.if %2 {
      %cst_8 = arith.constant 0.000000e+00 : f32
      %11 = vector.broadcast %cst_8 : f32 to vector<2x3xf32>
      %c0_9 = arith.constant 0 : index
      %c0_10 = arith.constant 0 : index
      %12 = vector.load %arg6[%c0_9, %c0_10] : memref<2x3xf32, #tpu.memory_space<vmem>>, vector<2x3xf32>
      tpu.vector_store %arg6[%c0_9, %c0_10], %11 {strides = array<i32>} : memref<2x3xf32, #tpu.memory_space<vmem>>, vector<2x3xf32>,
    } else {
    }
    %c0 = arith.constant 0 : index
    %c0_1 = arith.constant 0 : index
    %3 = vector.load %arg6[%c0, %c0_1] : memref<2x3xf32, #tpu.memory_space<vmem>>, vector<2x3xf32>
    %c0_2 = arith.constant 0 : index
    %c0_3 = arith.constant 0 : index
    %c0_4 = arith.constant 0 : index
    %4 = vector.load %arg1[%c0_2, %c0_3, %c0_4] : memref<2x3x128xf32, #tpu.memory_space<vmem>>, vector<2x3x128xf32>
    %cst = arith.constant dense<0.000000e+00> : vector<2x3xf32>
    %5 = vector.multi_reduction <add>, %4, %cst [2] : vector<2x3x128xf32> to vector<2x3xf32>
    %6 = arith.addf %3, %5 : vector<2x3xf32>
    %c0_5 = arith.constant 0 : index
    %c0_6 = arith.constant 0 : index
    %7 = vector.load %arg6[%c0_5, %c0_6] : memref<2x3xf32, #tpu.memory_space<vmem>>, vector<2x3xf32>
    tpu.vector_store %arg6[%c0_5, %c0_6], %6 {strides = array<i32>} : memref<2x3xf32, #tpu.memory_space<vmem>>, vector<2x3xf32>,
    %c1_i32 = arith.constant 1 : i32
    %8 = arith.cmpi eq, %arg0, %c1_i32 : i32
    %9 = arith.extui %8 : i1 to i32
    %c0_i32_7 = arith.constant 0 : i32
    %10 = arith.cmpi ne, %9, %c0_i32_7 : i32
    scf.if %10 {
      %c0_8 = arith.constant 0 : index
      %c0_9 = arith.constant 0 : index
      %11 = vector.load %arg6[%c0_8, %c0_9] : memref<2x3xf32, #tpu.memory_space<vmem>>, vector<2x3xf32>
      %c0_10 = arith.constant 0 : index
      %c0_11 = arith.constant 0 : index
      %12 = vector.load %arg2[%c0_10, %c0_11] : memref<3x2048xf32, #tpu.memory_space<vmem>>, vector<3x2048xf32>
      %cst_12 = arith.constant dense<0.000000e+00> : vector<2x2048xf32>
      %13 = tpu.matmul %11, %12, %cst_12 {dimension_numbers = #tpu.dot_dimension_numbers<[1], [0], [0], [1], [0, 0, 1, 1], [], []>} : vector<2x3xf32>, vector<3x2048xf32>, vector<2x2048xf32> -> vector<2x2048xf32>
      %c0_13 = arith.constant 0 : index
      %c0_14 = arith.constant 0 : index
      %14 = vector.load %arg3[%c0_13, %c0_14] : memref<2048x8xf32, #tpu.memory_space<vmem>>, vector<2048x8xf32>
      %cst_15 = arith.constant dense<0.000000e+00> : vector<2x8xf32>
      %15 = tpu.matmul %13, %14, %cst_15 {dimension_numbers = #tpu.dot_dimension_numbers<[1], [0], [0], [1], [0, 0, 1, 1], [], []>} : vector<2x2048xf32>, vector<2048x8xf32>, vector<2x8xf32> -> vector<2x8xf32>
      %c0_16 = arith.constant 0 : index
      %c0_17 = arith.constant 0 : index
      %16 = vector.load %arg4[%c0_16, %c0_17] : memref<1x8xf32, #tpu.memory_space<vmem>>, vector<1x8xf32>
      %17 = vector.broadcast %16 : vector<1x8xf32> to vector<2x8xf32>
      %18 = arith.addf %15, %17 : vector<2x8xf32>
      %c0_18 = arith.constant 0 : index
      %c0_19 = arith.constant 0 : index
      %19 = vector.load %arg5[%c0_18, %c0_19] : memref<2x8xf32, #tpu.memory_space<vmem>>, vector<2x8xf32>
      tpu.vector_store %arg5[%c0_18, %c0_19], %18 {strides = array<i32>} : memref<2x8xf32, #tpu.memory_space<vmem>>, vector<2x8xf32>,
    } else {
    }
    return
  }
  func.func @transform_0(%arg0: i32) -> (i32, i32, i32) {
    %c0_i32 = arith.constant 0 : i32
    %c0_i32_0 = arith.constant 0 : i32
    %c0_i32_1 = arith.constant 0 : i32
    return %c0_i32, %c0_i32_0, %arg0 : i32, i32, i32
  }
  func.func @transform_1(%arg0: i32) -> (i32, i32) {
    %c0_i32 = arith.constant 0 : i32
    %c0_i32_0 = arith.constant 0 : i32
    %c0_i32_1 = arith.constant 0 : i32
    return %c0_i32, %c0_i32_0 : i32, i32
  }
  func.func @transform_2(%arg0: i32) -> (i32, i32) {
    %c0_i32 = arith.constant 0 : i32
    %c0_i32_0 = arith.constant 0 : i32
    %c0_i32_1 = arith.constant 0 : i32
    return %c0_i32, %c0_i32_0 : i32, i32
  }
  func.func @transform_3(%arg0: i32) -> (i32, i32) {
    %c0_i32 = arith.constant 0 : i32
    %c0_i32_0 = arith.constant 0 : i32
    %c0_i32_1 = arith.constant 0 : i32
    return %c0_i32, %c0_i32_0 : i32, i32
  }
  func.func @transform_4(%arg0: i32) -> (i32, i32) {
    %c0_i32 = arith.constant 0 : i32
    %c0_i32_0 = arith.constant 0 : i32
    %c0_i32_1 = arith.constant 0 : i32
    return %c0_i32, %c0_i32_0 : i32, i32
  }
}

</mosaic_0001>

<bundles_post_ra>
// kernel: tpu_custom_call.1
= control target key start
LH: loop header
LB: loop body
LE: loop exit
PB: predicated region body
PF: predicated region fallthrough
CT: control target
= control target key end

     0   :  { %9 = vsyncpa [#allocation5], 0  ;;  %s1460_s15 = smov 0   ;;  %s1462_s16 = smov 0   ;;  %s2352_s0 = inlined_call_operand.vmem [shape: f32[2,3,256], index: 0, kind: input, shape index: {}]   ;;  %s2353_s1 = inlined_call_operand.vmem [shape: f32[3,2048], index: 1, kind: input, shape index: {}]   ;;  %s2354_s2 = inlined_call_operand.vmem [shape: f32[2048,8], index: 2, kind: input, shape index: {}]   ;;  %s2355_s3 = inlined_call_operand.vmem [shape: f32[1,8], index: 3, kind: input, shape index: {}]   ;;  %s2356_s4 = inlined_call_operand.hbm [shape: f32[2,8], index: 4, kind: output, shape index: {}]  }
   0x1   :  { %s1464_s17 = smov 0  }
   0x2 LB: > { %s1473_s18 = sadd.s32 4294967295, %s1431_s17   ;;  %s1475_s19 = sadd.s32 1, %s1431_s17   ;;  %s1431_s17 = sphi %s1464_s17, %s2359_s17   ;;  %s1427_s16 = sphi %s1462_s16, %s2358_s16   ;;  %s1423_s15 = sphi %s1460_s15, %s2357_s15  }
   0x3   : > { %s19_s20 = ssub.s32 %s1431_s17, %s1475_s19  ;;  %s22_s21 = sadd.s32 1, %s1427_s16 }
   0x4   : > { %p20_p0 = scmp.eq.s32.totalorder %s19_s20, 0  ;;  %p29_p1 = scmp.ne.s32.totalorder %s1427_s16, %s1423_s15 }
   0x5   : > { %p30_p2 = scmp.eq.s32.totalorder %s1431_s17, 0  ;;  %p1301_p4 = scmp.ge.s32.totalorder %s1431_s17, 2 }
   0x6   : > { %s1482_s22 = scalar_select %p20_p0, %s1427_s16, %s22_s21  }
   0x7   : > { %p31_p3 = por %p30_p2, %p29_p1  ;;  %148 = sbr.rel (%p1301_p4) target bundleno = 18 (0x12), region = 28 }
   0xc   : > { %151 = sbr.rel (!%p31_p3) target bundleno = 18 (0x12), region = 32  ;;  %s153_s23 = sand.u32 (%p31_p3), 1, %s1427_s16  }
   0xd   : > { %s1303_s24 = sshll.u32 (%p31_p3), %s1431_s17, 2  ;;  %s1302_s25 = sshll.u32 (%p31_p3), %s153_s23, 3 }
   0xe   : > { %s157_s28 = scalar_lea.vmem (%p31_p3), %s2352_s0, %s1303_s24  ;;  %s155_s29 = scalar_lea.vmem (%p31_p3), [#allocation3], %s1302_s25 }
   0xf   : > { %v174_v0 = vld [vmem:[%s157_s28] sm:$0xf] (%p31_p3)  ;;  %v176_v1 = vld [vmem:[%s157_s28 + $0x8] sm:$0xf] (%p31_p3) }
  0x10   : > { %175 = vst [vmem:[%s155_s29] sm:$0xf] (%p31_p3), %v174_v0 }
  0x11   : > { %177 = vst [vmem:[%s155_s29 + $0x4] sm:$0xf] %v176_v1 }
  0x12 PF: > { %p1304_p5 = scmp.ge.s32.totalorder %s1431_s17, 1  ;;  %p204_p6 = scmp.lt.s32.totalorder %s1431_s17, 3 }
  0x14   : > { %p205_p7 = pnand %p1304_p5, %p204_p6 }
  0x15   : > { %s211_s30 = sand.u32 (!%p205_p7), 1, %s1423_s15   ;;  %p1306_p8 = scmp.ne.s32.totalorder (!%p205_p7), %s1473_s18, 0 }
  0x16   : > { %208 = sbr.rel (%p205_p7) target bundleno = 520 (0x208), region = 73  ;;  %s1305_s5 = sshll.u32 (!%p205_p7), %s211_s30, 3 }
  0x17   : > { %s213_s6 = scalar_lea.vmem (!%p205_p7), [#allocation3], %s1305_s5 }
  0x1b   : > { %234 = sbr.rel (%p1306_p8) target bundleno = 34 (0x22), region = 81 }
  0x20   : > { %vm235_vm0 = vcmask 17408   ;;  %v1433_v2 = vmov 0.0  }
  0x21   : > { %236 = vst.msk [vmem:[#allocation2] sm:$0x3] %vm235_vm0, %v1433_v2 }
  0x22 PF: > { %v238_v3 = vld [vmem:[%s213_s6] sm:$0x7]  ;;  %vm240_vm1 = vcmask 1042432   ;;  %v239_v5 = vld [vmem:[%s213_s6 + $0x4] sm:$0x7]  ;;  %v249_v8 = vlaneseq  ;;  %vm253_vm2 = vcmask 1041409  }
  0x23   : > { %v241_v4 = vsel %vm240_vm1, %v238_v3, 0.0  ;;  %v244_v6 = vsel %vm240_vm1, %v239_v5, 0.0  ;;  %vm257_vm3 = vcmask 17408   ;;  %p1307_p9 = scmp.ne.s32.totalorder %s1473_s18, 1 }
  0x24   : > { %242 = vadd.xlane.f32.xlu0 %v241_v4  ;;  %v250_v9 = vand.u32 127, %v249_v8 }
  0x28   : > { %v237_v12 = vld [vmem:[#allocation2] sm:$0x3] }
  0x2c   : > { %245 = vadd.xlane.f32.xlu0 %v244_v6 }
  0x97   : > { %v243_v7 = vpop.xlane.xlu0 %242 }
  0x98   : > { %v251_v11 = vperm.slane %v243_v7, %v250_v9 }
  0x9f   : > { %v246_v10 = vpop.xlane.xlu0 %245 }
  0xa0   : > { %v252_v13 = vperm.slane %v246_v10, %v250_v9 }
  0xa1   : > { %262 = sbr.rel (%p1307_p9) target bundleno = 515 (0x203), region = 85 }
  0xa2   : > { %v254_v14 = vsel %vm253_vm2, %v252_v13, %v251_v11 }
  0xa3   : > { %v256_v15 = vadd.f32 %v254_v14, %v237_v12 }
  0xa5   : > { %258 = vst.msk [vmem:[#allocation2] sm:$0x3] %vm257_vm3, %v256_v15 }
  0xa6   : > { %v264_v16 = vld [vmem:[%s2353_s1] sm:$0x77]  ;;  %v265_v17 = vld [vmem:[%s2353_s1 + $0x8] sm:$0x77]  ;;  %v267_v18 = vld [vmem:[%s2353_s1 + $0x18] sm:$0x77] }
  0xa7   : > { %280 = vst [vmem:[#allocation1] ss:$2 sm:$0xff] %v264_v16  ;;  %v266_v19 = vld [vmem:[%s2353_s1 + $0x10] sm:$0x77]  ;;  %v268_v21 = vld [vmem:[%s2353_s1 + $0x20] sm:$0x77] }
  0xa8   : > { %282 = vst [vmem:[#allocation1 + $0x10] ss:$2 sm:$0xff] %v265_v17  ;;  %vm307_vm4 = vcmask 23552   ;;  %v269_v22 = vld [vmem:[%s2353_s1 + $0x28] sm:$0x77]  ;;  %v678_v41 = vld [vmem:[%s2354_s2 + $0x78] sm:$0xff] }
  0xa9   : > { %286 = vst [vmem:[#allocation1 + $0x30] ss:$2 sm:$0xff] %v267_v18  ;;  %v271_v23 = vld [vmem:[%s2353_s1 + $0x38] sm:$0x77]  ;;  %v270_v27 = vld [vmem:[%s2353_s1 + $0x30] sm:$0x77] }
  0xaa   : > { %284 = vst [vmem:[#allocation1 + $0x20] ss:$2 sm:$0xff] %v266_v19  ;;  %v677_v42 = vld [vmem:[%s2354_s2 + $0x70] sm:$0xff]  ;;  %v694_v43 = vld [vmem:[%s2354_s2 + $0xf8] sm:$0xff]  ;;  %v676_v46 = vld [vmem:[%s2354_s2 + $0x68] sm:$0xff]  ;;  %vm1243_vm5 = vcmask 58368  }
  0xab   : > { %v710_v44 = vld [vmem:[%s2354_s2 + $0x178] sm:$0xff]  ;;  %v693_v47 = vld [vmem:[%s2354_s2 + $0xf0] sm:$0xff]  ;;  %v675_v50 = vld [vmem:[%s2354_s2 + $0x60] sm:$0xff] }
  0xac   : > { %v1505_v20 = vld [vmem:[#allocation2] sm:$0x3]  ;;  %v726_v45 = vld [vmem:[%s2354_s2 + $0x1f8] sm:$0xff]  ;;  %v709_v48 = vld [vmem:[%s2354_s2 + $0x170] sm:$0xff] }
  0xad   : > { %v725_v49 = vld [vmem:[%s2354_s2 + $0x1f0] sm:$0xff]  ;;  %v692_v51 = vld [vmem:[%s2354_s2 + $0xe8] sm:$0xff]  ;;  %v674_v53 = vld [vmem:[%s2354_s2 + $0x58] sm:$0xff] }
  0xae   : > { %v287_v24 = vld.sshfl [vmem:[#allocation1] sm:$0xff pattern:$0x75316420]  ;;  %v288_v25 = vld.sshfl [vmem:[#allocation1 + $0x8] sm:$0xff pattern:$0x75316420] }
  0xaf   : > { %1308 = vmatpush.msk.msra.mxu0 %vm240_vm1, %v287_v24  ;;  %v289_v26 = vld.sshfl [vmem:[#allocation1 + $0x10] sm:$0xff pattern:$0x75316420]  ;;  %295 = vst [vmem:[#allocation1] ss:$2 sm:$0xff] %v268_v21  ;;  %1310 = vmatpush.msk.msra.mxu1 %vm240_vm1, %v288_v25  ;;  %v708_v52 = vld [vmem:[%s2354_s2 + $0x168] sm:$0xff] }
  0xb0   : > { %1312 = vmatpush.msk.msra.mxu2 %vm240_vm1, %v289_v26  ;;  %1309 = vmatmul.msk.f32.vlgmr.msra.gmra.mxu0 %vm307_vm4, %v1505_v20  ;;  %v290_v28 = vld.sshfl [vmem:[#allocation1 + $0x18] sm:$0xff pattern:$0x75316420]  ;;  %v293_v29 = vld.sshfl [vmem:[#allocation1 + $0x30] sm:$0xff pattern:$0x75316420] }
  0xb1   : > { %1313 = vmatmul.msk.f32.vlgmr.msra.gmra.mxu2 %vm307_vm4, %v1505_v20  ;;  %296 = vst [vmem:[#allocation1 + $0x10] ss:$2 sm:$0xff] %v269_v22  ;;  %1314 = vmatpush.msk.msra.mxu3 %vm240_vm1, %v290_v28  ;;  %v294_v30 = vld.sshfl [vmem:[#allocation1 + $0x38] sm:$0xff pattern:$0x75316420]  ;;  %v691_v54 = vld [vmem:[%s2354_s2 + $0xe0] sm:$0xff] }
  0xb2   : > { %1311 = vmatmul.msk.f32.vlgmr.msra.gmra.mxu1 %vm307_vm4, %v1505_v20  ;;  %1315 = vmatmul.msk.f32.vlgmr.msra.gmra.mxu3 %vm307_vm4, %v1505_v20  ;;  %298 = vst [vmem:[#allocation1 + $0x30] ss:$2 sm:$0xff] %v271_v23  ;;  %v291_v31 = vld.sshfl [vmem:[#allocation1 + $0x20] sm:$0xff pattern:$0x75316420]  ;;  %v673_v55 = vld [vmem:[%s2354_s2 + $0x50] sm:$0xff] }
  0xb3   : > { %1320 = vmatpush.msk.msrb.mxu2 %vm240_vm1, %v293_v29  ;;  %1322 = vmatpush.msk.msrb.mxu3 %vm240_vm1, %v294_v30  ;;  %v292_v32 = vld.sshfl [vmem:[#allocation1 + $0x28] sm:$0xff pattern:$0x75316420]  ;;  %v707_v56 = vld [vmem:[%s2354_s2 + $0x160] sm:$0xff]  ;;  %v690_v58 = vld [vmem:[%s2354_s2 + $0xd8] sm:$0xff] }
  0xb4   : > { %1316 = vmatpush.msk.msrb.mxu0 %vm240_vm1, %v291_v31  ;;  %297 = vst [vmem:[#allocation1 + $0x20] ss:$2 sm:$0xff] %v270_v27  ;;  %1318 = vmatpush.msk.msrb.mxu1 %vm240_vm1, %v292_v32  ;;  %v724_v57 = vld [vmem:[%s2354_s2 + $0x1e8] sm:$0xff]  ;;  %v706_v60 = vld [vmem:[%s2354_s2 + $0x158] sm:$0xff]  ;;  %v723_v61 = vld [vmem:[%s2354_s2 + $0x1e0] sm:$0xff] }
  0xb5   : > { %v672_v59 = vld [vmem:[%s2354_s2 + $0x48] sm:$0xff]  ;;  %v689_v62 = vld [vmem:[%s2354_s2 + $0xd0] sm:$0xff]  ;;  %v671_v63 = vld [vmem:[%s2354_s2 + $0x40] sm:$0xff] }
  0xb6   : > { %v299_v33 = vld.sshfl [vmem:[#allocation1] sm:$0xff pattern:$0x75316420]  ;;  %v300_v34 = vld.sshfl [vmem:[#allocation1 + $0x8] sm:$0xff pattern:$0x75316420] }
  0xb7   : > { %1324 = vmatpush.msk.msra.mxu0 %vm240_vm1, %v299_v33  ;;  %1326 = vmatpush.msk.msra.mxu1 %vm240_vm1, %v300_v34  ;;  %v705_v0 = vld [vmem:[%s2354_s2 + $0x150] sm:$0xff]  ;;  %v722_v1 = vld [vmem:[%s2354_s2 + $0x1d8] sm:$0xff]  ;;  %v688_v2 = vld [vmem:[%s2354_s2 + $0xc8] sm:$0xff] }
  0xb8   : > { %1317 = vmatmul.msk.f32.vlgmr.msrb.gmra.mxu0 %vm307_vm4, %v1505_v20  ;;  %v301_v35 = vld.sshfl [vmem:[#allocation1 + $0x10] sm:$0xff pattern:$0x75316420]  ;;  %v302_v36 = vld.sshfl [vmem:[#allocation1 + $0x18] sm:$0xff pattern:$0x75316420] }
  0xb9   : > { %1321 = vmatmul.msk.f32.vlgmr.msrb.gmra.mxu2 %vm307_vm4, %v1505_v20  ;;  %1330 = vmatpush.msk.msra.mxu3 %vm240_vm1, %v302_v36  ;;  %v305_v37 = vld.sshfl [vmem:[#allocation1 + $0x30] sm:$0xff pattern:$0x75316420]  ;;  %v306_v38 = vld.sshfl [vmem:[#allocation1 + $0x38] sm:$0xff pattern:$0x75316420] }
  0xba   : > { %1323 = vmatmul.msk.f32.vlgmr.msrb.gmra.mxu3 %vm307_vm4, %v1505_v20  ;;  %1319 = vmatmul.msk.f32.vlgmr.msrb.gmra.mxu1 %vm307_vm4, %v1505_v20  ;;  %v670_v3 = vld [vmem:[%s2354_s2 + $0x38] sm:$0xff]  ;;  %v704_v4 = vld [vmem:[%s2354_s2 + $0x148] sm:$0xff]  ;;  %v721_v5 = vld [vmem:[%s2354_s2 + $0x1d0] sm:$0xff] }
  0xbb   : > { %1328 = vmatpush.msk.msra.mxu2 %vm240_vm1, %v301_v35  ;;  %1338 = vmatpush.msk.msrb.mxu3 %vm240_vm1, %v306_v38  ;;  %v303_v39 = vld.sshfl [vmem:[#allocation1 + $0x20] sm:$0xff pattern:$0x75316420]  ;;  %v304_v40 = vld.sshfl [vmem:[#allocation1 + $0x28] sm:$0xff pattern:$0x75316420] }
  0xbc   : > { %1332 = vmatpush.msk.msrb.mxu0 %vm240_vm1, %v303_v39  ;;  %1334 = vmatpush.msk.msrb.mxu1 %vm240_vm1, %v304_v40  ;;  %v687_v6 = vld [vmem:[%s2354_s2 + $0xc0] sm:$0xff]  ;;  %v669_v7 = vld [vmem:[%s2354_s2 + $0x30] sm:$0xff]  ;;  %v720_v9 = vld [vmem:[%s2354_s2 + $0x1c8] sm:$0xff] }
  0xbd   : > { %1336 = vmatpush.msk.msrb.mxu2 %vm240_vm1, %v305_v37  ;;  %v703_v8 = vld [vmem:[%s2354_s2 + $0x140] sm:$0xff]  ;;  %v686_v10 = vld [vmem:[%s2354_s2 + $0xb8] sm:$0xff]  ;;  %v668_v11 = vld [vmem:[%s2354_s2 + $0x28] sm:$0xff] }
  0xbe   : > { %v702_v12 = vld [vmem:[%s2354_s2 + $0x138] sm:$0xff]  ;;  %v719_v13 = vld [vmem:[%s2354_s2 + $0x1c0] sm:$0xff]  ;;  %v685_v14 = vld [vmem:[%s2354_s2 + $0xb0] sm:$0xff] }
  0xbf   : > { %v667_v15 = vld [vmem:[%s2354_s2 + $0x20] sm:$0xff]  ;;  %v701_v16 = vld [vmem:[%s2354_s2 + $0x130] sm:$0xff]  ;;  %v718_v17 = vld [vmem:[%s2354_s2 + $0x1b8] sm:$0xff] }
  0xc0   : > { %1325 = vmatmul.msk.f32.vlgmr.msra.gmra.mxu0 %vm307_vm4, %v1505_v20  ;;  %v684_v18 = vld [vmem:[%s2354_s2 + $0xa8] sm:$0xff]  ;;  %v666_v19 = vld [vmem:[%s2354_s2 + $0x18] sm:$0xff]  ;;  %v717_v21 = vld [vmem:[%s2354_s2 + $0x1b0] sm:$0xff] }
  0xc1   : > { %1329 = vmatmul.msk.f32.vlgmr.msra.gmra.mxu2 %vm307_vm4, %v1505_v20  ;;  %923 = vmatpush.msra.mxu0 %v678_v41  ;;  %v683_v22 = vld [vmem:[%s2354_s2 + $0xa0] sm:$0xff]  ;;  %v665_v23 = vld [vmem:[%s2354_s2 + $0x10] sm:$0xff]  ;;  %v716_v25 = vld [vmem:[%s2354_s2 + $0x1a8] sm:$0xff] }
  0xc2   : > { %1327 = vmatmul.msk.f32.vlgmr.msra.gmra.mxu1 %vm307_vm4, %v1505_v20  ;;  %1331 = vmatmul.msk.f32.vlgmr.msra.gmra.mxu3 %vm307_vm4, %v1505_v20  ;;  %v699_v24 = vld [vmem:[%s2354_s2 + $0x120] sm:$0xff]  ;;  %v682_v26 = vld [vmem:[%s2354_s2 + $0x98] sm:$0xff]  ;;  %v664_v27 = vld [vmem:[%s2354_s2 + $0x8] sm:$0xff] }
  0xc3   : > { %924 = vmatpush.msra.mxu0 %v677_v42  ;;  %943 = vmatpush.msra.mxu1 %v694_v43  ;;  %v698_v28 = vld [vmem:[%s2354_s2 + $0x118] sm:$0xff]  ;;  %v715_v29 = vld [vmem:[%s2354_s2 + $0x1a0] sm:$0xff]  ;;  %v681_v30 = vld [vmem:[%s2354_s2 + $0x90] sm:$0xff] }
  0xc4   : > { %963 = vmatpush.msra.mxu2 %v710_v44  ;;  %983 = vmatpush.msra.mxu3 %v726_v45  ;;  %v663_v31 = vld [vmem:[%s2354_s2] sm:$0xff]  ;;  %v742_v32 = vld [vmem:[%s2354_s2 + $0x278] sm:$0xff]  ;;  %v697_v33 = vld [vmem:[%s2354_s2 + $0x110] sm:$0xff] }
  0xc5   : > { %925 = vmatpush.msra.mxu0 %v676_v46  ;;  %944 = vmatpush.msra.mxu1 %v693_v47  ;;  %v680_v34 = vld [vmem:[%s2354_s2 + $0x88] sm:$0xff]  ;;  %v714_v35 = vld [vmem:[%s2354_s2 + $0x198] sm:$0xff]  ;;  %v741_v36 = vld [vmem:[%s2354_s2 + $0x270] sm:$0xff] }
  0xc6   : > { %964 = vmatpush.msra.mxu2 %v709_v48  ;;  %984 = vmatpush.msra.mxu3 %v725_v49  ;;  %v696_v37 = vld [vmem:[%s2354_s2 + $0x108] sm:$0xff]  ;;  %v679_v38 = vld [vmem:[%s2354_s2 + $0x80] sm:$0xff]  ;;  %v713_v39 = vld [vmem:[%s2354_s2 + $0x190] sm:$0xff] }
  0xc7   : > { %926 = vmatpush.msra.mxu0 %v675_v50  ;;  %945 = vmatpush.msra.mxu1 %v692_v51  ;;  %v758_v40 = vld [vmem:[%s2354_s2 + $0x2f8] sm:$0xff]  ;;  %v740_v41 = vld [vmem:[%s2354_s2 + $0x268] sm:$0xff]  ;;  %v695_v42 = vld [vmem:[%s2354_s2 + $0x100] sm:$0xff] }
  0xc8   : > { %1333 = vmatmul.msk.f32.vlgmr.msrb.gmra.mxu0 %vm307_vm4, %v1505_v20  ;;  %965 = vmatpush.msra.mxu2 %v708_v52  ;;  %v712_v43 = vld [vmem:[%s2354_s2 + $0x188] sm:$0xff]  ;;  %v757_v44 = vld [vmem:[%s2354_s2 + $0x2f0] sm:$0xff]  ;;  %v739_v45 = vld [vmem:[%s2354_s2 + $0x260] sm:$0xff] }
  0xc9   : > { %1337 = vmatmul.msk.f32.vlgmr.msrb.gmra.mxu2 %vm307_vm4, %v1505_v20  ;;  %927 = vmatpush.msra.mxu0 %v674_v53  ;;  %v774_v46 = vld [vmem:[%s2354_s2 + $0x378] sm:$0xff]  ;;  %v711_v47 = vld [vmem:[%s2354_s2 + $0x180] sm:$0xff]  ;;  %v756_v48 = vld [vmem:[%s2354_s2 + $0x2e8] sm:$0xff] }
  0xca   : > { %1335 = vmatmul.msk.f32.vlgmr.msrb.gmra.mxu1 %vm307_vm4, %v1505_v20  ;;  %1339 = vmatmul.msk.f32.vlgmr.msrb.gmra.mxu3 %vm307_vm4, %v1505_v20  ;;  %v700_v20 = vld [vmem:[%s2354_s2 + $0x128] sm:$0xff]  ;;  %v738_v49 = vld [vmem:[%s2354_s2 + $0x258] sm:$0xff]  ;;  %v773_v50 = vld [vmem:[%s2354_s2 + $0x370] sm:$0xff] }
  0xcb   : > { %946 = vmatpush.msra.mxu1 %v691_v54  ;;  %928 = vmatpush.msra.mxu0 %v673_v55  ;;  %v790_v51 = vld [vmem:[%s2354_s2 + $0x3f8] sm:$0xff]  ;;  %v755_v52 = vld [vmem:[%s2354_s2 + $0x2e0] sm:$0xff]  ;;  %v737_v53 = vld [vmem:[%s2354_s2 + $0x250] sm:$0xff] }
  0xcc   : > { %966 = vmatpush.msra.mxu2 %v707_v56  ;;  %985 = vmatpush.msra.mxu3 %v724_v57  ;;  %v772_v54 = vld [vmem:[%s2354_s2 + $0x368] sm:$0xff]  ;;  %v789_v55 = vld [vmem:[%s2354_s2 + $0x3f0] sm:$0xff]  ;;  %v754_v56 = vld [vmem:[%s2354_s2 + $0x2d8] sm:$0xff] }
  0xcd   : > { %947 = vmatpush.msra.mxu1 %v690_v58  ;;  %929 = vmatpush.msra.mxu0 %v672_v59  ;;  %v736_v57 = vld [vmem:[%s2354_s2 + $0x248] sm:$0xff]  ;;  %v771_v58 = vld [vmem:[%s2354_s2 + $0x360] sm:$0xff] }
  0xce   : > { %967 = vmatpush.msra.mxu2 %v706_v60  ;;  %986 = vmatpush.msra.mxu3 %v723_v61  ;;  %v788_v59 = vld [vmem:[%s2354_s2 + $0x3e8] sm:$0xff]  ;;  %v753_v60 = vld [vmem:[%s2354_s2 + $0x2d0] sm:$0xff]  ;;  %v735_v61 = vld [vmem:[%s2354_s2 + $0x240] sm:$0xff] }
  0xcf   : > { %948 = vmatpush.msra.mxu1 %v689_v62  ;;  %930 = vmatpush.msra.mxu0 %v671_v63  ;;  %v770_v62 = vld [vmem:[%s2354_s2 + $0x358] sm:$0xff]  ;;  %v787_v63 = vld [vmem:[%s2354_s2 + $0x3e0] sm:$0xff] }
  0xd0   : > { %968 = vmatpush.msra.mxu2 %v705_v0  ;;  %987 = vmatpush.msra.mxu3 %v722_v1  ;;  %v752_v0 = vld [vmem:[%s2354_s2 + $0x2c8] sm:$0xff]  ;;  %v734_v1 = vld [vmem:[%s2354_s2 + $0x238] sm:$0xff] }
  0xd1   : > { %949 = vmatpush.msra.mxu1 %v688_v2  ;;  %931 = vmatpush.msra.mxu0 %v670_v3  ;;  %v769_v2 = vld [vmem:[%s2354_s2 + $0x350] sm:$0xff]  ;;  %v786_v3 = vld [vmem:[%s2354_s2 + $0x3d8] sm:$0xff] }
  0xd2   : > { %969 = vmatpush.msra.mxu2 %v704_v4  ;;  %988 = vmatpush.msra.mxu3 %v721_v5  ;;  %v751_v4 = vld [vmem:[%s2354_s2 + $0x2c0] sm:$0xff]  ;;  %v733_v5 = vld [vmem:[%s2354_s2 + $0x230] sm:$0xff] }
  0xd3   : > { %950 = vmatpush.msra.mxu1 %v687_v6  ;;  %932 = vmatpush.msra.mxu0 %v669_v7  ;;  %v768_v6 = vld [vmem:[%s2354_s2 + $0x348] sm:$0xff]  ;;  %v785_v7 = vld [vmem:[%s2354_s2 + $0x3d0] sm:$0xff] }
  0xd4   : > { %970 = vmatpush.msra.mxu2 %v703_v8  ;;  %989 = vmatpush.msra.mxu3 %v720_v9  ;;  %v750_v8 = vld [vmem:[%s2354_s2 + $0x2b8] sm:$0xff]  ;;  %v732_v9 = vld [vmem:[%s2354_s2 + $0x228] sm:$0xff] }
  0xd5   : > { %951 = vmatpush.msra.mxu1 %v686_v10  ;;  %933 = vmatpush.msra.mxu0 %v668_v11  ;;  %v767_v10 = vld [vmem:[%s2354_s2 + $0x340] sm:$0xff]  ;;  %v784_v11 = vld [vmem:[%s2354_s2 + $0x3c8] sm:$0xff] }
  0xd6   : > { %971 = vmatpush.msra.mxu2 %v702_v12  ;;  %990 = vmatpush.msra.mxu3 %v719_v13  ;;  %v749_v12 = vld [vmem:[%s2354_s2 + $0x2b0] sm:$0xff]  ;;  %v731_v13 = vld [vmem:[%s2354_s2 + $0x220] sm:$0xff] }
  0xd7   : > { %952 = vmatpush.msra.mxu1 %v685_v14  ;;  %934 = vmatpush.msra.mxu0 %v667_v15  ;;  %v766_v14 = vld [vmem:[%s2354_s2 + $0x338] sm:$0xff]  ;;  %v783_v15 = vld [vmem:[%s2354_s2 + $0x3c0] sm:$0xff] }
  0xd8   : > { %972 = vmatpush.msra.mxu2 %v701_v16  ;;  %991 = vmatpush.msra.mxu3 %v718_v17  ;;  %v748_v16 = vld [vmem:[%s2354_s2 + $0x2a8] sm:$0xff]  ;;  %v730_v17 = vld [vmem:[%s2354_s2 + $0x218] sm:$0xff] }
  0xd9   : > { %953 = vmatpush.msra.mxu1 %v684_v18  ;;  %935 = vmatpush.msra.mxu0 %v666_v19  ;;  %v765_v18 = vld [vmem:[%s2354_s2 + $0x330] sm:$0xff]  ;;  %v782_v19 = vld [vmem:[%s2354_s2 + $0x3b8] sm:$0xff] }
  0xda   : > { %973 = vmatpush.msra.mxu2 %v700_v20  ;;  %992 = vmatpush.msra.mxu3 %v717_v21  ;;  %v747_v20 = vld [vmem:[%s2354_s2 + $0x2a0] sm:$0xff]  ;;  %v729_v21 = vld [vmem:[%s2354_s2 + $0x210] sm:$0xff] }
  0xdb   : > { %954 = vmatpush.msra.mxu1 %v683_v22  ;;  %936 = vmatpush.msra.mxu0 %v665_v23  ;;  %v764_v22 = vld [vmem:[%s2354_s2 + $0x328] sm:$0xff]  ;;  %v781_v23 = vld [vmem:[%s2354_s2 + $0x3b0] sm:$0xff] }
  0xdc   : > { %974 = vmatpush.msra.mxu2 %v699_v24  ;;  %993 = vmatpush.msra.mxu3 %v716_v25  ;;  %v746_v24 = vld [vmem:[%s2354_s2 + $0x298] sm:$0xff]  ;;  %v728_v25 = vld [vmem:[%s2354_s2 + $0x208] sm:$0xff] }
  0xdd   : > { %955 = vmatpush.msra.mxu1 %v682_v26  ;;  %937 = vmatpush.msra.mxu0 %v664_v27  ;;  %v763_v26 = vld [vmem:[%s2354_s2 + $0x320] sm:$0xff]  ;;  %v780_v27 = vld [vmem:[%s2354_s2 + $0x3a8] sm:$0xff] }
  0xde   : > { %975 = vmatpush.msra.mxu2 %v698_v28  ;;  %994 = vmatpush.msra.mxu3 %v715_v29  ;;  %v745_v28 = vld [vmem:[%s2354_s2 + $0x290] sm:$0xff]  ;;  %v727_v29 = vld [vmem:[%s2354_s2 + $0x200] sm:$0xff] }
  0xdf   : > { %956 = vmatpush.msra.mxu1 %v681_v30  ;;  %938 = vmatpush.msra.mxu0 %v663_v31  ;;  %v744_v30 = vld [vmem:[%s2354_s2 + $0x288] sm:$0xff]  ;;  %v762_v31 = vld [vmem:[%s2354_s2 + $0x318] sm:$0xff] }
  0xe0   : > { %976 = vmatpush.msra.mxu2 %v697_v33  ;;  %995 = vmatpush.msra.mxu3 %v714_v35  ;;  %v743_v33 = vld [vmem:[%s2354_s2 + $0x280] sm:$0xff]  ;;  %v778_v35 = vld [vmem:[%s2354_s2 + $0x398] sm:$0xff] }
  0xe1   : > { %1003 = vmatpush.msrb.mxu0 %v742_v32  ;;  %957 = vmatpush.msra.mxu1 %v680_v34  ;;  %v779_v32 = vld [vmem:[%s2354_s2 + $0x3a0] sm:$0xff]  ;;  %v761_v34 = vld [vmem:[%s2354_s2 + $0x310] sm:$0xff] }
  0xe2   : > { %977 = vmatpush.msra.mxu2 %v696_v37  ;;  %996 = vmatpush.msra.mxu3 %v713_v39  ;;  %v777_v37 = vld [vmem:[%s2354_s2 + $0x390] sm:$0xff]  ;;  %v776_v39 = vld [vmem:[%s2354_s2 + $0x388] sm:$0xff] }
  0xe3   : > { %1004 = vmatpush.msrb.mxu0 %v741_v36  ;;  %958 = vmatpush.msra.mxu1 %v679_v38  ;;  %v760_v36 = vld [vmem:[%s2354_s2 + $0x308] sm:$0xff]  ;;  %v759_v38 = vld [vmem:[%s2354_s2 + $0x300] sm:$0xff] }
  0xe4   : > { %978 = vmatpush.msra.mxu2 %v695_v42  ;;  %997 = vmatpush.msra.mxu3 %v712_v43  ;;  %v805_v43 = vld [vmem:[%s2354_s2 + $0x470] sm:$0xff] }
  0xe5   : > { %1023 = vmatpush.msrb.mxu1 %v758_v40  ;;  %1005 = vmatpush.msrb.mxu0 %v740_v41  ;;  %v775_v40 = vld [vmem:[%s2354_s2 + $0x380] sm:$0xff]  ;;  %v806_v41 = vld [vmem:[%s2354_s2 + $0x478] sm:$0xff] }
  0xe6   : > { %1043 = vmatpush.msrb.mxu2 %v774_v46  ;;  %998 = vmatpush.msra.mxu3 %v711_v47  ;;  %v804_v46 = vld [vmem:[%s2354_s2 + $0x468] sm:$0xff]  ;;  %v821_v47 = vld [vmem:[%s2354_s2 + $0x4f0] sm:$0xff] }
  0xe7   : > { %1024 = vmatpush.msrb.mxu1 %v757_v44  ;;  %1006 = vmatpush.msrb.mxu0 %v739_v45  ;;  %v822_v44 = vld [vmem:[%s2354_s2 + $0x4f8] sm:$0xff] }
  0xe8   : > { %1044 = vmatpush.msrb.mxu2 %v773_v50  ;;  %1063 = vmatpush.msrb.mxu3 %v790_v51  ;;  %v838_v50 = vld [vmem:[%s2354_s2 + $0x578] sm:$0xff] }
  0xe9   : > { %1025 = vmatpush.msrb.mxu1 %v756_v48  ;;  %1007 = vmatpush.msrb.mxu0 %v738_v49  ;;  %v803_v48 = vld [vmem:[%s2354_s2 + $0x460] sm:$0xff]  ;;  %v820_v49 = vld [vmem:[%s2354_s2 + $0x4e8] sm:$0xff] }
  0xea   : > { %1045 = vmatpush.msrb.mxu2 %v772_v54  ;;  %1064 = vmatpush.msrb.mxu3 %v789_v55  ;;  %v819_v54 = vld [vmem:[%s2354_s2 + $0x4e0] sm:$0xff]  ;;  %v837_v55 = vld [vmem:[%s2354_s2 + $0x570] sm:$0xff] }
  0xeb   : > { %1026 = vmatpush.msrb.mxu1 %v755_v52  ;;  %1008 = vmatpush.msrb.mxu0 %v737_v53  ;;  %v802_v52 = vld [vmem:[%s2354_s2 + $0x458] sm:$0xff] }
  0xec   : > { %1046 = vmatpush.msrb.mxu2 %v771_v58  ;;  %1065 = vmatpush.msrb.mxu3 %v788_v59  ;;  %v818_v58 = vld [vmem:[%s2354_s2 + $0x4d8] sm:$0xff]  ;;  %v836_v59 = vld [vmem:[%s2354_s2 + $0x568] sm:$0xff] }
  0xed   : > { %1027 = vmatpush.msrb.mxu1 %v754_v56  ;;  %1009 = vmatpush.msrb.mxu0 %v736_v57  ;;  %v854_v56 = vld [vmem:[%s2354_s2 + $0x5f8] sm:$0xff]  ;;  %v801_v57 = vld [vmem:[%s2354_s2 + $0x450] sm:$0xff] }
  0xee   : > { %1047 = vmatpush.msrb.mxu2 %v770_v62  ;;  %1066 = vmatpush.msrb.mxu3 %v787_v63  ;;  %v817_v62 = vld [vmem:[%s2354_s2 + $0x4d0] sm:$0xff]  ;;  %v835_v63 = vld [vmem:[%s2354_s2 + $0x560] sm:$0xff] }
  0xef   : > { %1028 = vmatpush.msrb.mxu1 %v753_v60  ;;  %1010 = vmatpush.msrb.mxu0 %v735_v61  ;;  %v853_v60 = vld [vmem:[%s2354_s2 + $0x5f0] sm:$0xff]  ;;  %v800_v61 = vld [vmem:[%s2354_s2 + $0x448] sm:$0xff] }
  0xf0   : > { %1048 = vmatpush.msrb.mxu2 %v769_v2  ;;  %1067 = vmatpush.msrb.mxu3 %v786_v3  ;;  %v816_v2 = vld [vmem:[%s2354_s2 + $0x4c8] sm:$0xff] }
  0xf1   : > { %1029 = vmatpush.msrb.mxu1 %v752_v0  ;;  %1011 = vmatpush.msrb.mxu0 %v734_v1  ;;  %v852_v0 = vld [vmem:[%s2354_s2 + $0x5e8] sm:$0xff]  ;;  %v799_v1 = vld [vmem:[%s2354_s2 + $0x440] sm:$0xff] }
  0xf2   : > { %1049 = vmatpush.msrb.mxu2 %v768_v6  ;;  %1068 = vmatpush.msrb.mxu3 %v785_v7 }
  0xf3   : > { %1030 = vmatpush.msrb.mxu1 %v751_v4  ;;  %1012 = vmatpush.msrb.mxu0 %v733_v5  ;;  %v834_v4 = vld [vmem:[%s2354_s2 + $0x558] sm:$0xff]  ;;  %v851_v5 = vld [vmem:[%s2354_s2 + $0x5e0] sm:$0xff] }
  0xf4   : > { %1050 = vmatpush.msrb.mxu2 %v767_v10  ;;  %1069 = vmatpush.msrb.mxu3 %v784_v11  ;;  %v833_v10 = vld [vmem:[%s2354_s2 + $0x550] sm:$0xff]  ;;  %v850_v11 = vld [vmem:[%s2354_s2 + $0x5d8] sm:$0xff] }
  0xf5   : > { %1031 = vmatpush.msrb.mxu1 %v750_v8  ;;  %1013 = vmatpush.msrb.mxu0 %v732_v9  ;;  %v798_v8 = vld [vmem:[%s2354_s2 + $0x438] sm:$0xff]  ;;  %v815_v9 = vld [vmem:[%s2354_s2 + $0x4c0] sm:$0xff] }
  0xf6   : > { %1051 = vmatpush.msrb.mxu2 %v766_v14  ;;  %1070 = vmatpush.msrb.mxu3 %v783_v15  ;;  %v814_v14 = vld [vmem:[%s2354_s2 + $0x4b8] sm:$0xff]  ;;  %v832_v15 = vld [vmem:[%s2354_s2 + $0x548] sm:$0xff] }
  0xf7   : > { %1032 = vmatpush.msrb.mxu1 %v749_v12  ;;  %1014 = vmatpush.msrb.mxu0 %v731_v13  ;;  %v797_v13 = vld [vmem:[%s2354_s2 + $0x430] sm:$0xff] }
  0xf8   : > { %1052 = vmatpush.msrb.mxu2 %v765_v18  ;;  %1071 = vmatpush.msrb.mxu3 %v782_v19  ;;  %v813_v18 = vld [vmem:[%s2354_s2 + $0x4b0] sm:$0xff]  ;;  %v831_v19 = vld [vmem:[%s2354_s2 + $0x540] sm:$0xff] }
  0xf9   : > { %1033 = vmatpush.msrb.mxu1 %v748_v16  ;;  %1015 = vmatpush.msrb.mxu0 %v730_v17  ;;  %v849_v16 = vld [vmem:[%s2354_s2 + $0x5d0] sm:$0xff]  ;;  %v796_v17 = vld [vmem:[%s2354_s2 + $0x428] sm:$0xff] }
  0xfa   : > { %1053 = vmatpush.msrb.mxu2 %v764_v22  ;;  %1072 = vmatpush.msrb.mxu3 %v781_v23  ;;  %v812_v22 = vld [vmem:[%s2354_s2 + $0x4a8] sm:$0xff]  ;;  %v830_v23 = vld [vmem:[%s2354_s2 + $0x538] sm:$0xff] }
  0xfb   : > { %1034 = vmatpush.msrb.mxu1 %v747_v20  ;;  %1016 = vmatpush.msrb.mxu0 %v729_v21  ;;  %v848_v20 = vld [vmem:[%s2354_s2 + $0x5c8] sm:$0xff]  ;;  %v795_v21 = vld [vmem:[%s2354_s2 + $0x420] sm:$0xff] }
  0xfc   : > { %1054 = vmatpush.msrb.mxu2 %v763_v26  ;;  %1073 = vmatpush.msrb.mxu3 %v780_v27  ;;  %v811_v26 = vld [vmem:[%s2354_s2 + $0x4a0] sm:$0xff]  ;;  %v829_v27 = vld [vmem:[%s2354_s2 + $0x530] sm:$0xff] }
  0xfd   : > { %1035 = vmatpush.msrb.mxu1 %v746_v24  ;;  %1017 = vmatpush.msrb.mxu0 %v728_v25  ;;  %v847_v24 = vld [vmem:[%s2354_s2 + $0x5c0] sm:$0xff]  ;;  %v794_v25 = vld [vmem:[%s2354_s2 + $0x418] sm:$0xff] }
  0xfe   : > { %1055 = vmatpush.msrb.mxu2 %v762_v31  ;;  %1074 = vmatpush.msrb.mxu3 %v779_v32  ;;  %v828_v31 = vld [vmem:[%s2354_s2 + $0x528] sm:$0xff]  ;;  %v845_v32 = vld [vmem:[%s2354_s2 + $0x5b0] sm:$0xff] }
  0xff   : > { %1036 = vmatpush.msrb.mxu1 %v745_v28  ;;  %1018 = vmatpush.msrb.mxu0 %v727_v29  ;;  %v846_v28 = vld [vmem:[%s2354_s2 + $0x5b8] sm:$0xff]  ;;  %v793_v29 = vld [vmem:[%s2354_s2 + $0x410] sm:$0xff] }
 0x100   : > { %1056 = vmatpush.msrb.mxu2 %v761_v34  ;;  %1075 = vmatpush.msrb.mxu3 %v778_v35  ;;  %v809_v34 = vld [vmem:[%s2354_s2 + $0x490] sm:$0xff]  ;;  %v827_v35 = vld [vmem:[%s2354_s2 + $0x520] sm:$0xff] }
 0x101   : > { %1037 = vmatpush.msrb.mxu1 %v744_v30  ;;  %v810_v30 = vld [vmem:[%s2354_s2 + $0x498] sm:$0xff] }
 0x102   : > { %1057 = vmatpush.msrb.mxu2 %v760_v36  ;;  %1076 = vmatpush.msrb.mxu3 %v777_v37  ;;  %v844_v36 = vld [vmem:[%s2354_s2 + $0x5a8] sm:$0xff]  ;;  %v791_v37 = vld [vmem:[%s2354_s2 + $0x400] sm:$0xff] }
 0x103   : > { %1038 = vmatpush.msrb.mxu1 %v743_v33  ;;  %v792_v33 = vld [vmem:[%s2354_s2 + $0x408] sm:$0xff] }
 0x104   : > { %1058 = vmatpush.msrb.mxu2 %v759_v38  ;;  %1077 = vmatpush.msrb.mxu3 %v776_v39  ;;  %v808_v38 = vld [vmem:[%s2354_s2 + $0x488] sm:$0xff]  ;;  %v826_v39 = vld [vmem:[%s2354_s2 + $0x518] sm:$0xff] }
 0x106   : > { %1078 = vmatpush.msrb.mxu3 %v775_v40 }
 0x12d   : > { %v360_v42 = vpop.f32.mrf.mxu0 }
 0x12e   : > { %939 = vmatmul.f32.vlgmr.msra.gmra.mxu0 %v360_v42  ;;  %v870_v42 = vld [vmem:[%s2354_s2 + $0x678] sm:$0xff] }
 0x12f   : > { %1083 = vmatpush.msra.mxu0 %v806_v41  ;;  %v380_v45 = vpop.f32.mrf.mxu1  ;;  %v843_v41 = vld [vmem:[%s2354_s2 + $0x5a0] sm:$0xff] }
 0x130   : > { %959 = vmatmul.f32.vlgmr.msra.gmra.mxu1 %v380_v45  ;;  %v842_v45 = vld [vmem:[%s2354_s2 + $0x598] sm:$0xff] }
 0x131   : > { %1084 = vmatpush.msra.mxu0 %v805_v43  ;;  %1103 = vmatpush.msra.mxu1 %v822_v44  ;;  %v807_v43 = vld [vmem:[%s2354_s2 + $0x480] sm:$0xff]  ;;  %v825_v44 = vld [vmem:[%s2354_s2 + $0x510] sm:$0xff] }
 0x133   : > { %1085 = vmatpush.msra.mxu0 %v804_v46  ;;  %1104 = vmatpush.msra.mxu1 %v821_v47  ;;  %v869_v47 = vld [vmem:[%s2354_s2 + $0x670] sm:$0xff] }
 0x134   : > { %v400_v51 = vpop.f32.mrf.mxu2 }
 0x135   : > { %979 = vmatmul.f32.vlgmr.msra.gmra.mxu2 %v400_v51  ;;  %1086 = vmatpush.msra.mxu0 %v803_v48  ;;  %v420_v53 = vpop.f32.mrf.mxu3  ;;  %v440_v6 = vpop.f32.mrf.mxu0  ;;  %v886_v48 = vld [vmem:[%s2354_s2 + $0x6f8] sm:$0xff]  ;;  %v868_v51 = vld [vmem:[%s2354_s2 + $0x668] sm:$0xff] }
 0x136   : > { %1105 = vmatpush.msra.mxu1 %v820_v49  ;;  %1123 = vmatpush.msra.mxu2 %v838_v50  ;;  %v824_v49 = vld [vmem:[%s2354_s2 + $0x508] sm:$0xff]  ;;  %v841_v50 = vld [vmem:[%s2354_s2 + $0x590] sm:$0xff] }
 0x137   : > { %999 = vmatmul.f32.vlgmr.msra.gmra.mxu3 %v420_v53  ;;  %1087 = vmatpush.msra.mxu0 %v802_v52  ;;  %v460_v12 = vpop.f32.mrf.mxu1  ;;  %v885_v52 = vld [vmem:[%s2354_s2 + $0x6f0] sm:$0xff]  ;;  %v823_v53 = vld [vmem:[%s2354_s2 + $0x500] sm:$0xff] }
 0x138   : > { %1106 = vmatpush.msra.mxu1 %v819_v54  ;;  %1124 = vmatpush.msra.mxu2 %v837_v55  ;;  %v840_v55 = vld [vmem:[%s2354_s2 + $0x588] sm:$0xff] }
 0x139   : > { %1143 = vmatpush.msra.mxu3 %v854_v56  ;;  %1088 = vmatpush.msra.mxu0 %v801_v57  ;;  %v867_v56 = vld [vmem:[%s2354_s2 + $0x660] sm:$0xff]  ;;  %v884_v57 = vld [vmem:[%s2354_s2 + $0x6e8] sm:$0xff] }
 0x13a   : > { %1107 = vmatpush.msra.mxu1 %v818_v58  ;;  %1125 = vmatpush.msra.mxu2 %v836_v59  ;;  %v902_v58 = vld [vmem:[%s2354_s2 + $0x778] sm:$0xff]  ;;  %v839_v59 = vld [vmem:[%s2354_s2 + $0x580] sm:$0xff] }
 0x13b   : > { %1144 = vmatpush.msra.mxu3 %v853_v60  ;;  %1089 = vmatpush.msra.mxu0 %v800_v61  ;;  %v866_v61 = vld [vmem:[%s2354_s2 + $0x658] sm:$0xff] }
 0x13c   : > { %1108 = vmatpush.msra.mxu1 %v817_v62  ;;  %1126 = vmatpush.msra.mxu2 %v835_v63  ;;  %v480_v3 = vpop.f32.mrf.mxu2  ;;  %v883_v62 = vld [vmem:[%s2354_s2 + $0x6e0] sm:$0xff]  ;;  %v901_v63 = vld [vmem:[%s2354_s2 + $0x770] sm:$0xff] }
 0x13d   : > { %1145 = vmatpush.msra.mxu3 %v852_v0  ;;  %1059 = vmatmul.f32.vlgmr.msrb.gmra.mxu2 %v480_v3  ;;  %v500_v7 = vpop.f32.mrf.mxu3  ;;  %v520_v40 = vpop.f32.mrf.mxu0  ;;  %v918_v0 = vld [vmem:[%s2354_s2 + $0x7f8] sm:$0xff]  ;;  %v900_v3 = vld [vmem:[%s2354_s2 + $0x768] sm:$0xff] }
 0x13e   : > { %1090 = vmatpush.msra.mxu0 %v799_v1  ;;  %1109 = vmatpush.msra.mxu1 %v816_v2  ;;  %v865_v1 = vld [vmem:[%s2354_s2 + $0x650] sm:$0xff]  ;;  %v882_v2 = vld [vmem:[%s2354_s2 + $0x6d8] sm:$0xff] }
 0x13f   : > { %1127 = vmatpush.msra.mxu2 %v834_v4  ;;  %1146 = vmatpush.msra.mxu3 %v851_v5  ;;  %v540_v46 = vpop.f32.mrf.mxu1  ;;  %v917_v4 = vld [vmem:[%s2354_s2 + $0x7f0] sm:$0xff]  ;;  %v864_v5 = vld [vmem:[%s2354_s2 + $0x648] sm:$0xff] }
 0x140   : > { %1019 = vmatmul.f32.vlgmr.msrb.gmra.mxu0 %v440_v6  ;;  %1079 = vmatmul.f32.vlgmr.msrb.gmra.mxu3 %v500_v7  ;;  %v881_v6 = vld [vmem:[%s2354_s2 + $0x6d0] sm:$0xff]  ;;  %v899_v7 = vld [vmem:[%s2354_s2 + $0x760] sm:$0xff] }
 0x141   : > { %1091 = vmatpush.msra.mxu0 %v798_v8  ;;  %1110 = vmatpush.msra.mxu1 %v815_v9  ;;  %v916_v8 = vld [vmem:[%s2354_s2 + $0x7e8] sm:$0xff]  ;;  %v863_v9 = vld [vmem:[%s2354_s2 + $0x640] sm:$0xff] }
 0x142   : > { %1128 = vmatpush.msra.mxu2 %v833_v10  ;;  %1147 = vmatpush.msra.mxu3 %v850_v11  ;;  %v880_v10 = vld [vmem:[%s2354_s2 + $0x6c8] sm:$0xff]  ;;  %v898_v11 = vld [vmem:[%s2354_s2 + $0x758] sm:$0xff] }
 0x143   : > { %1039 = vmatmul.f32.vlgmr.msrb.gmra.mxu1 %v460_v12  ;;  %1092 = vmatpush.msra.mxu0 %v797_v13  ;;  %v915_v12 = vld [vmem:[%s2354_s2 + $0x7e0] sm:$0xff]  ;;  %v862_v13 = vld [vmem:[%s2354_s2 + $0x638] sm:$0xff] }
 0x144   : > { %1111 = vmatpush.msra.mxu1 %v814_v14  ;;  %1129 = vmatpush.msra.mxu2 %v832_v15  ;;  %v560_v54 = vpop.f32.mrf.mxu2  ;;  %v879_v14 = vld [vmem:[%s2354_s2 + $0x6c0] sm:$0xff]  ;;  %v897_v15 = vld [vmem:[%s2354_s2 + $0x750] sm:$0xff] }
 0x145   : > { %1148 = vmatpush.msra.mxu3 %v849_v16  ;;  %1093 = vmatpush.msra.mxu0 %v796_v17  ;;  %v580_v60 = vpop.f32.mrf.mxu3  ;;  %v914_v16 = vld [vmem:[%s2354_s2 + $0x7d8] sm:$0xff]  ;;  %v861_v17 = vld [vmem:[%s2354_s2 + $0x630] sm:$0xff] }
 0x146   : > { %1112 = vmatpush.msra.mxu1 %v813_v18  ;;  %1130 = vmatpush.msra.mxu2 %v831_v19  ;;  %v878_v18 = vld [vmem:[%s2354_s2 + $0x6b8] sm:$0xff]  ;;  %v896_v19 = vld [vmem:[%s2354_s2 + $0x748] sm:$0xff] }
 0x147   : > { %1149 = vmatpush.msra.mxu3 %v848_v20  ;;  %1094 = vmatpush.msra.mxu0 %v795_v21  ;;  %v913_v20 = vld [vmem:[%s2354_s2 + $0x7d0] sm:$0xff]  ;;  %v860_v21 = vld [vmem:[%s2354_s2 + $0x628] sm:$0xff] }
 0x148   : > { %1113 = vmatpush.msra.mxu1 %v812_v22  ;;  %1131 = vmatpush.msra.mxu2 %v830_v23  ;;  %v877_v22 = vld [vmem:[%s2354_s2 + $0x6b0] sm:$0xff]  ;;  %v895_v23 = vld [vmem:[%s2354_s2 + $0x740] sm:$0xff] }
 0x149   : > { %1150 = vmatpush.msra.mxu3 %v847_v24  ;;  %1095 = vmatpush.msra.mxu0 %v794_v25  ;;  %v912_v24 = vld [vmem:[%s2354_s2 + $0x7c8] sm:$0xff]  ;;  %v859_v25 = vld [vmem:[%s2354_s2 + $0x620] sm:$0xff] }
 0x14a   : > { %1114 = vmatpush.msra.mxu1 %v811_v26  ;;  %1132 = vmatpush.msra.mxu2 %v829_v27  ;;  %v876_v26 = vld [vmem:[%s2354_s2 + $0x6a8] sm:$0xff]  ;;  %v894_v27 = vld [vmem:[%s2354_s2 + $0x738] sm:$0xff] }
 0x14b   : > { %1151 = vmatpush.msra.mxu3 %v846_v28  ;;  %1096 = vmatpush.msra.mxu0 %v793_v29  ;;  %v911_v28 = vld [vmem:[%s2354_s2 + $0x7c0] sm:$0xff]  ;;  %v858_v29 = vld [vmem:[%s2354_s2 + $0x618] sm:$0xff] }
 0x14c   : > { %1115 = vmatpush.msra.mxu1 %v810_v30  ;;  %1133 = vmatpush.msra.mxu2 %v828_v31  ;;  %v875_v30 = vld [vmem:[%s2354_s2 + $0x6a0] sm:$0xff]  ;;  %v893_v31 = vld [vmem:[%s2354_s2 + $0x730] sm:$0xff] }
 0x14d   : > { %1152 = vmatpush.msra.mxu3 %v845_v32  ;;  %1097 = vmatpush.msra.mxu0 %v792_v33  ;;  %v910_v32 = vld [vmem:[%s2354_s2 + $0x7b8] sm:$0xff]  ;;  %v857_v33 = vld [vmem:[%s2354_s2 + $0x610] sm:$0xff] }
 0x14e   : > { %1116 = vmatpush.msra.mxu1 %v809_v34  ;;  %1134 = vmatpush.msra.mxu2 %v827_v35  ;;  %v874_v34 = vld [vmem:[%s2354_s2 + $0x698] sm:$0xff]  ;;  %v892_v35 = vld [vmem:[%s2354_s2 + $0x728] sm:$0xff] }
 0x14f   : > { %1153 = vmatpush.msra.mxu3 %v844_v36  ;;  %1098 = vmatpush.msra.mxu0 %v791_v37  ;;  %v909_v36 = vld [vmem:[%s2354_s2 + $0x7b0] sm:$0xff]  ;;  %v856_v37 = vld [vmem:[%s2354_s2 + $0x608] sm:$0xff] }
 0x150   : > { %1117 = vmatpush.msra.mxu1 %v808_v38  ;;  %1135 = vmatpush.msra.mxu2 %v826_v39  ;;  %v873_v38 = vld [vmem:[%s2354_s2 + $0x690] sm:$0xff]  ;;  %v891_v39 = vld [vmem:[%s2354_s2 + $0x720] sm:$0xff] }
 0x151   : > { %1154 = vmatpush.msra.mxu3 %v843_v41  ;;  %1099 = vmatmul.f32.vlgmr.msra.gmra.mxu0 %v520_v40  ;;  %v908_v40 = vld [vmem:[%s2354_s2 + $0x7a8] sm:$0xff]  ;;  %v855_v41 = vld [vmem:[%s2354_s2 + $0x600] sm:$0xff] }
 0x152   : > { %1163 = vmatpush.msrb.mxu0 %v870_v42  ;;  %1118 = vmatpush.msra.mxu1 %v807_v43  ;;  %v872_v42 = vld [vmem:[%s2354_s2 + $0x688] sm:$0xff]  ;;  %v890_v43 = vld [vmem:[%s2354_s2 + $0x718] sm:$0xff] }
 0x153   : > { %1136 = vmatpush.msra.mxu2 %v825_v44  ;;  %1155 = vmatpush.msra.mxu3 %v842_v45  ;;  %v600_v44 = vpop.f32.mrf.mxu0  ;;  %v907_v45 = vld [vmem:[%s2354_s2 + $0x7a0] sm:$0xff] }
 0x154   : > { %1119 = vmatmul.f32.vlgmr.msra.gmra.mxu1 %v540_v46  ;;  %1164 = vmatpush.msrb.mxu0 %v869_v47  ;;  %v871_v46 = vld [vmem:[%s2354_s2 + $0x680] sm:$0xff]  ;;  %v889_v47 = vld [vmem:[%s2354_s2 + $0x710] sm:$0xff] }
 0x155   : > { %1183 = vmatpush.msrb.mxu1 %v886_v48  ;;  %1137 = vmatpush.msra.mxu2 %v824_v49  ;;  %v620_v48 = vpop.f32.mrf.mxu1  ;;  %v906_v49 = vld [vmem:[%s2354_s2 + $0x798] sm:$0xff] }
 0x156   : > { %1156 = vmatpush.msra.mxu3 %v841_v50  ;;  %1165 = vmatpush.msrb.mxu0 %v868_v51  ;;  %v888_v50 = vld [vmem:[%s2354_s2 + $0x708] sm:$0xff]  ;;  %v905_v51 = vld [vmem:[%s2354_s2 + $0x790] sm:$0xff] }
 0x157   : > { %1184 = vmatpush.msrb.mxu1 %v885_v52  ;;  %1138 = vmatpush.msra.mxu2 %v823_v53  ;;  %v887_v52 = vld [vmem:[%s2354_s2 + $0x700] sm:$0xff]  ;;  %v640_v53 = vpop.f32.mrf.mxu2 }
 0x158   : > { %1157 = vmatpush.msra.mxu3 %v840_v55  ;;  %1139 = vmatmul.f32.vlgmr.msra.gmra.mxu2 %v560_v54  ;;  %v904_v54 = vld [vmem:[%s2354_s2 + $0x788] sm:$0xff]  ;;  %v903_v55 = vld [vmem:[%s2354_s2 + $0x780] sm:$0xff] }
 0x159   : > { %1166 = vmatpush.msrb.mxu0 %v867_v56  ;;  %1185 = vmatpush.msrb.mxu1 %v884_v57  ;;  %v660_v56 = vpop.f32.mrf.mxu3  ;;  %v1376_v57 = vld [vmem:[%s2355_s3] ss:$0 sm:$0xff] }
 0x15a   : > { %1203 = vmatpush.msrb.mxu2 %v902_v58  ;;  %1158 = vmatpush.msra.mxu3 %v839_v59 }
 0x15b   : > { %1159 = vmatmul.f32.vlgmr.msra.gmra.mxu3 %v580_v60  ;;  %1167 = vmatpush.msrb.mxu0 %v866_v61 }
 0x15c   : > { %1186 = vmatpush.msrb.mxu1 %v883_v62  ;;  %1204 = vmatpush.msrb.mxu2 %v901_v63 }
 0x15d   : > { %1223 = vmatpush.msrb.mxu3 %v918_v0  ;;  %1168 = vmatpush.msrb.mxu0 %v865_v1 }
 0x15e   : > { %1187 = vmatpush.msrb.mxu1 %v882_v2  ;;  %1205 = vmatpush.msrb.mxu2 %v900_v3 }
 0x15f   : > { %1224 = vmatpush.msrb.mxu3 %v917_v4  ;;  %1169 = vmatpush.msrb.mxu0 %v864_v5 }
 0x160   : > { %1188 = vmatpush.msrb.mxu1 %v881_v6  ;;  %1206 = vmatpush.msrb.mxu2 %v899_v7 }
 0x161   : > { %1225 = vmatpush.msrb.mxu3 %v916_v8  ;;  %1170 = vmatpush.msrb.mxu0 %v863_v9 }
 0x162   : > { %1189 = vmatpush.msrb.mxu1 %v880_v10  ;;  %1207 = vmatpush.msrb.mxu2 %v898_v11 }
 0x163   : > { %1226 = vmatpush.msrb.mxu3 %v915_v12  ;;  %1171 = vmatpush.msrb.mxu0 %v862_v13 }
 0x164   : > { %1190 = vmatpush.msrb.mxu1 %v879_v14  ;;  %1208 = vmatpush.msrb.mxu2 %v897_v15 }
 0x165   : > { %1227 = vmatpush.msrb.mxu3 %v914_v16  ;;  %1172 = vmatpush.msrb.mxu0 %v861_v17 }
 0x166   : > { %1191 = vmatpush.msrb.mxu1 %v878_v18  ;;  %1209 = vmatpush.msrb.mxu2 %v896_v19 }
 0x167   : > { %1228 = vmatpush.msrb.mxu3 %v913_v20  ;;  %1173 = vmatpush.msrb.mxu0 %v860_v21 }
 0x168   : > { %1192 = vmatpush.msrb.mxu1 %v877_v22  ;;  %1210 = vmatpush.msrb.mxu2 %v895_v23 }
 0x169   : > { %1229 = vmatpush.msrb.mxu3 %v912_v24  ;;  %1174 = vmatpush.msrb.mxu0 %v859_v25 }
 0x16a   : > { %1193 = vmatpush.msrb.mxu1 %v876_v26  ;;  %1211 = vmatpush.msrb.mxu2 %v894_v27 }
 0x16b   : > { %1230 = vmatpush.msrb.mxu3 %v911_v28  ;;  %1175 = vmatpush.msrb.mxu0 %v858_v29 }
 0x16c   : > { %1194 = vmatpush.msrb.mxu1 %v875_v30  ;;  %1212 = vmatpush.msrb.mxu2 %v893_v31 }
 0x16d   : > { %1231 = vmatpush.msrb.mxu3 %v910_v32  ;;  %1176 = vmatpush.msrb.mxu0 %v857_v33 }
 0x16e   : > { %1195 = vmatpush.msrb.mxu1 %v874_v34  ;;  %1213 = vmatpush.msrb.mxu2 %v892_v35 }
 0x16f   : > { %1232 = vmatpush.msrb.mxu3 %v909_v36  ;;  %1177 = vmatpush.msrb.mxu0 %v856_v37 }
 0x170   : > { %1196 = vmatpush.msrb.mxu1 %v873_v38  ;;  %1214 = vmatpush.msrb.mxu2 %v891_v39 }
 0x171   : > { %1233 = vmatpush.msrb.mxu3 %v908_v40  ;;  %1178 = vmatpush.msrb.mxu0 %v855_v41 }
 0x172   : > { %1197 = vmatpush.msrb.mxu1 %v872_v42  ;;  %1215 = vmatpush.msrb.mxu2 %v890_v43 }
 0x173   : > { %1234 = vmatpush.msrb.mxu3 %v907_v45  ;;  %1179 = vmatmul.f32.vlgmr.msrb.gmra.mxu0 %v600_v44 }
 0x174   : > { %1198 = vmatpush.msrb.mxu1 %v871_v46  ;;  %1216 = vmatpush.msrb.mxu2 %v889_v47 }
 0x175   : > { %1235 = vmatpush.msrb.mxu3 %v906_v49  ;;  %1199 = vmatmul.f32.vlgmr.msrb.gmra.mxu1 %v620_v48 }
 0x176   : > { %1217 = vmatpush.msrb.mxu2 %v888_v50 }
 0x177   : > { %1236 = vmatpush.msrb.mxu3 %v905_v51 }
 0x178   : > { %1218 = vmatpush.msrb.mxu2 %v887_v52 }
 0x179   : > { %1237 = vmatpush.msrb.mxu3 %v904_v54  ;;  %1219 = vmatmul.f32.vlgmr.msrb.gmra.mxu2 %v640_v53 }
 0x17b   : > { %1238 = vmatpush.msrb.mxu3 %v903_v55 }
 0x17c   : > { %1239 = vmatmul.f32.vlgmr.msrb.gmra.mxu3 %v660_v56 }
 0x1ab   : > { %v940_v58 = vpop.f32.mrf.mxu0 }
 0x1ac   : > { %v941_v59 = vadd.f32 %v1376_v57, %v940_v58 }
 0x1ad   : > { %v960_v60 = vpop.f32.mrf.mxu1 }
 0x1ae   : > { %v961_v61 = vadd.f32 %v960_v60, %v941_v59 }
 0x1b8   : > { %v980_v62 = vpop.f32.mrf.mxu2 }
 0x1b9   : > { %v981_v63 = vadd.f32 %v980_v62, %v961_v61 }
 0x1ba   : > { %v1000_v0 = vpop.f32.mrf.mxu3 }
 0x1bb   : > { %v1001_v1 = vadd.f32 %v1000_v0, %v981_v63 }
 0x1bd   : > { %v1020_v2 = vpop.f32.mrf.mxu0 }
 0x1be   : > { %v1021_v3 = vadd.f32 %v1020_v2, %v1001_v1 }
 0x1c0   : > { %v1040_v4 = vpop.f32.mrf.mxu1  ;;  %v1060_v6 = vpop.f32.mrf.mxu2 }
 0x1c1   : > { %v1041_v5 = vadd.f32 %v1040_v4, %v1021_v3 }
 0x1c3   : > { %v1061_v7 = vadd.f32 %v1060_v6, %v1041_v5  ;;  %v1080_v8 = vpop.f32.mrf.mxu3 }
 0x1c5   : > { %v1081_v10 = vadd.f32 %v1080_v8, %v1061_v7 }
 0x1ce   : > { %v1100_v9 = vpop.f32.mrf.mxu0 }
 0x1cf   : > { %v1101_v11 = vadd.f32 %v1100_v9, %v1081_v10 }
 0x1d1   : > { %v1120_v12 = vpop.f32.mrf.mxu1 }
 0x1d2   : > { %v1121_v14 = vadd.f32 %v1120_v12, %v1101_v11 }
 0x1db   : > { %v1140_v13 = vpop.f32.mrf.mxu2 }
 0x1dc   : > { %v1141_v15 = vadd.f32 %v1140_v13, %v1121_v14 }
 0x1de   : > { %v1160_v16 = vpop.f32.mrf.mxu3 }
 0x1df   : > { %v1161_v18 = vadd.f32 %v1160_v16, %v1141_v15 }
 0x1f0   : > { %v1180_v17 = vpop.f32.mrf.mxu0 }
 0x1f1   : > { %v1181_v19 = vadd.f32 %v1180_v17, %v1161_v18 }
 0x1f2   : > { %v1200_v20 = vpop.f32.mrf.mxu1 }
 0x1f3   : > { %v1201_v21 = vadd.f32 %v1200_v20, %v1181_v19 }
 0x1fc   : > { %v1220_v22 = vpop.f32.mrf.mxu2 }
 0x1fd   : > { %v1221_v23 = vadd.f32 %v1220_v22, %v1201_v21 }
 0x1ff   : > { %v1240_v24 = vpop.f32.mrf.mxu3 }
 0x200   : > { %v1241_v25 = vadd.f32 %v1240_v24, %v1221_v23 }
 0x202   : > { %1244 = vst.msk [vmem:[#allocation4] sm:$0x3] %vm1243_vm5, %v1241_v25 }
 0x203 PF: > { %p1348_p10 = scmp.eq.s32.totalorder %s1473_s18, 1  ;;  %s1434_s9 = smov [#allocation4]  }
 0x204   : > { %s1251_s10 = sshll.u32 %s1434_s9, 4  ;;  %s1253_s13 = sshll.u32 %s2356_s4, 4  ;;  %s1252_s10 = int_to_ptr.vmem [resolvable:$true] %s1251_s10  ;;  %s1254_s13 = int_to_ptr.hbm [resolvable:$true] %s1253_s13 }
 0x205   : > { %1345 = dma.vmem_to_hbm [thread:$0]  (%p1348_p10), %s1252_s10, 32, %s1254_s13, [#allocation5]  }
 0x206   : > { %1418 = dma.done.wait (%p1348_p10), [#allocation5], 32  }
 0x207   : > { %1420 = vsyncadd (%p1348_p10), [#allocation5], 4294967264 }
 0x208 PF: > { %p12_p11 = scmp.ge.s32.totalorder %s1475_s19, 4   ;;  %s2357_s15 = smov %s1427_s16 }
 0x209   : > { %s2358_s16 = smov %s1482_s22  ;;  %s2359_s17 = smov %s1475_s19 }
 0x20a   :  { %14 = sbr.rel (!%p12_p11) target bundleno = 2 (0x2), region = 120 }
 0x20f   :  { %1267 = vsyncpa [#allocation5], 1 }
 0x210   :  { %1269 = vsyncpa [#allocation5 + $0x1], 1 }

</bundles_post_ra>
